<compile_context>
chip_gen: v5e
topology: v5e:2x2
jax: 0.10.0
libtpu: 0.0.40
codegen_flags: <defaults>
</compile_context>

<pallas_src>
import numpy as np
import jax
import jax.numpy as jnp
from jax.experimental import pallas as pl
from jax.experimental.pallas import tpu as pltpu

_N_TERMS = 8   # l1, mse, invariant_l1, chroma, luma, luma_mse, frequency, sharpness
_LANES = 128


# --------------------------------------------------------------------------- #
# Host-side constant builders                                                  #
# --------------------------------------------------------------------------- #
def _dct_matrix(n):
    # torch_dct.dct with norm=None: X[k] = 2 * sum_i x[i] * cos(pi*(2i+1)*k/(2n))
    k = np.arange(n)[:, None].astype(np.float64)
    i = np.arange(n)[None, :].astype(np.float64)
    return (2.0 * np.cos(np.pi * (2.0 * i + 1.0) * k / (2.0 * n))).astype(np.float32)


def _reflect_index(j, n):
    # torch 'reflect' padding (edge sample not repeated); robust for small n.
    if n == 1:
        return 0
    while j < 0 or j >= n:
        if j < 0:
            j = -j
        if j >= n:
            j = 2 * (n - 1) - j
    return j


def _gaussian_blur_matrix(n, ksize=11, sigma=1.0):
    # torchvision gaussian_blur: linspace taps, reflect padding, baked into a
    # dense (n, n) 1-D blur matrix (the 2-D blur is separable).
    half = (ksize - 1) * 0.5
    xs = np.linspace(-half, half, ksize)
    g = np.exp(-0.5 * (xs / sigma) ** 2)
    g = g / g.sum()
    pad = ksize // 2
    m = np.zeros((n, n), dtype=np.float64)
    for i in range(n):
        for kk in range(ksize):
            m[i, _reflect_index(i - pad + kk, n)] += g[kk]
    return m.astype(np.float32)


# --------------------------------------------------------------------------- #
# Pallas kernel                                                                #
# --------------------------------------------------------------------------- #
def _lane_partial(x):
    """Sum x over every axis except the lane (last) axis, folded to 128 lanes.

    Returns a (1, 128) float32 row; the wrapper's final lane-sum yields the full
    scalar.  Keeps the per-term cross-lane XLU reduce tree out of the kernel.
    """
    x = x.astype(jnp.float32)
    L = x.shape[-1]
    v = jnp.sum(x.reshape(-1, L), axis=0, keepdims=True)              # (1, L)
    pad = (-L) % _LANES
    if pad:
        v = jnp.concatenate([v, jnp.zeros((1, pad), jnp.float32)], axis=-1)
    return jnp.sum(v.reshape(-1, _LANES), axis=0, keepdims=True)      # (1, 128)


def _loss_kernel(p_ref, t_ref, lht_ref, rw_ref, out_ref):
    # p_ref / t_ref : (bt, C, H, W)  input tiles
    # lht_ref       : (2, H, H)   = [dct_H^T ; blur_H^T]   (transposed left mats)
    # rw_ref        : (W, 2W)     = [dct_W^T | blur_W^T]   (shared right mats)
    # out_ref       : (1, 8, 128) lane-partial sums per loss term
    diff = p_ref[...].astype(jnp.float32) - t_ref[...].astype(jnp.float32)
    bt, C, H, W = diff.shape
    G = bt * C
    mm_dtype = rw_ref.dtype

    # ---- plain elementwise terms --------------------------------------------
    p_l1 = _lane_partial(jnp.abs(diff))
    p_mse = _lane_partial(diff * diff)

    # invariant_l1: per-sample mean over (C,H,W) removed; the per-image means of
    # pred and target are linear, so they collapse onto diff.
    # TODO(synk): 'invariant_l1' is dispatched by the reference forward but is
    # missing from its loss_modules dict; L1 of the mean-removed diff is assumed.
    if bt == 1:
        mean_shift = jnp.sum(diff) * (1.0 / (C * H * W))
    else:
        mean_shift = jnp.sum(diff, axis=(1, 2, 3), keepdims=True) * (1.0 / (C * H * W))
    p_inv = _lane_partial(jnp.abs(diff - mean_shift))

    # ---- YCbCr terms on diff (kornia convention; +0.5 offsets cancel) --------
    dr, dg, db = diff[:, 0], diff[:, 1], diff[:, 2]
    y_d = 0.299 * dr + 0.587 * dg + 0.114 * db
    cb_d = (db - y_d) * 0.564
    cr_d = (dr - y_d) * 0.713
    p_luma = _lane_partial(jnp.abs(y_d))
    p_luma_mse = _lane_partial(y_d * y_d)
    p_chroma = _lane_partial(jnp.abs(cb_d)) + _lane_partial(jnp.abs(cr_d))

    # ---- DCT + blur: 3 large MXU matmuls (DCT and (x - blur x) are linear) ----
    # (1) shared right-multiply:  (G*H, W) @ (W, 2W) -> (G*H, 2W)
    diff2 = diff.reshape(G * H, W).astype(mm_dtype)
    right = jnp.dot(diff2, rw_ref[...], preferred_element_type=jnp.float32)
    right = right.reshape(G, H, 2 * W)

    # (2)+(3) transposed left-multiplies: sum(|A|) is transpose-invariant, so
    # swap the last two axes once and fold all images into two single large
    # matmuls (G*W, H) @ (H, H) — no broadcast_to, no per-image tiny matmuls.
    t_dct_t = jnp.swapaxes(right[:, :, :W], 1, 2).reshape(G * W, H).astype(mm_dtype)
    t_blur_t = jnp.swapaxes(right[:, :, W:], 1, 2).reshape(G * W, H).astype(mm_dtype)
    dct2d_t = jnp.dot(t_dct_t, lht_ref[0], preferred_element_type=jnp.float32)
    blur2d_t = jnp.dot(t_blur_t, lht_ref[1], preferred_element_type=jnp.float32)

    p_freq = _lane_partial(jnp.abs(dct2d_t))
    diff_t = jnp.swapaxes(diff.reshape(G, H, W), 1, 2).reshape(G * W, H)
    p_sharp = _lane_partial(jnp.abs(diff_t - blur2d_t))

    out_ref[0] = jnp.concatenate(
        [p_l1, p_mse, p_inv, p_chroma, p_luma, p_luma_mse, p_freq, p_sharp], axis=0)


# --------------------------------------------------------------------------- #
# Wrapper                                                                      #
# --------------------------------------------------------------------------- #
def _vmem_need_bytes(bb, C, H, W, in_elt, mm_elt):
    elems = bb * C * H * W
    return int(
        2 * 2 * elems * in_elt               # pred/target tiles, double-buffered
        + (2 * H * H + 2 * W * W) * mm_elt   # single-buffered constant matrices
        + 12 * elems * 4                     # f32 in-kernel temporaries
        + 2 * elems * mm_elt                 # matmul-dtype operand copies
        + 2 * _N_TERMS * _LANES * 4)         # output block (double-buffered)


def combined_perceptual_loss(pred, target, lambdas, *, batch_block=None,
                             matmul_dtype=jnp.bfloat16):
    """Weighted sum of the active CombinedPerceptualLoss terms.

    matmul_dtype controls only the DCT/blur matmul operands (accumulation stays
    f32 via preferred_element_type); bf16 is MXU-native on v5e/v6e/v7x.  Pass
    jnp.float32 to track the PyTorch numerics more tightly.
    """
    assert pred.shape == target.shape and pred.shape[1] == 3
    B, C, H, W = pred.shape
    in_elt = jnp.dtype(pred.dtype).itemsize
    mm_elt = jnp.dtype(matmul_dtype).itemsize

    # Generation-aware VMEM budget (~25% headroom for Mosaic internal scratch):
    # ~48 MiB on v7x (64 MiB physical), ~96 MiB on v5e/v6e (128 MiB physical).
    try:
        phys = int(getattr(pltpu.get_tpu_info(), "vmem_capacity_bytes", 64 * 2**20))
    except Exception:
        phys = 64 * 2**20
    budget_cap = max(int(phys * 0.75), 16 * 2**20)

    # Pick the largest batch_block (divisor of B) whose per-block footprint fits
    # the budget while keeping >= 2 grid blocks (so both v7x TCs get work).
    if batch_block is None:
        batch_block = 1
        for bb in range(1, B + 1):
            if B % bb:
                continue
            if B >= 2 and (B // bb) < 2:
                continue
            if _vmem_need_bytes(bb, C, H, W, in_elt, mm_elt) <= budget_cap:
                batch_block = bb
    assert B % batch_block == 0, "batch_block must divide the batch size"
    n_blocks = B // batch_block

    need = _vmem_need_bytes(batch_block, C, H, W, in_elt, mm_elt)
    vmem_limit = min(max(need, 32 * 2**20), budget_cap)
    vmem_limit = max(vmem_limit, need)      # never clamp below the true need
    vmem_limit = int(min(vmem_limit, phys))

    # Packed constants: transposed left matrices stacked, right matrices concat.
    lht = jnp.asarray(
        np.stack([_dct_matrix(H).T, _gaussian_blur_matrix(H).T], axis=0),
        dtype=matmul_dtype)                                            # (2, H, H)
    rw = jnp.asarray(
        np.concatenate([_dct_matrix(W).T, _gaussian_blur_matrix(W).T], axis=1),
        dtype=matmul_dtype)                                            # (W, 2W)

    grid_spec = pltpu.PrefetchScalarGridSpec(
        num_scalar_prefetch=0,
        grid=(n_blocks,),
        in_specs=[
            pl.BlockSpec((batch_block, C, H, W), lambda g: (g, 0, 0, 0)),
            pl.BlockSpec((batch_block, C, H, W), lambda g: (g, 0, 0, 0)),
            # Constant index maps -> single-buffer (recovers a full constant copy
            # of VMEM, the dominant saving at large H, W).
            pl.BlockSpec((2, H, H), lambda g: (0, 0, 0),
                         pipeline_mode=pl.Buffered(buffer_count=1)),
            pl.BlockSpec((W, 2 * W), lambda g: (0, 0),
                         pipeline_mode=pl.Buffered(buffer_count=1)),
        ],
        out_specs=pl.BlockSpec((1, _N_TERMS, _LANES), lambda g: (g, 0, 0)),
    )

    flops = 4 * B * C * H * W * (H + W)          # the 3 matmuls per block, summed
    bytes_accessed = (2 * B * C * H * W * in_elt
                      + (2 * H * H + 2 * W * W) * mm_elt
                      + n_blocks * _N_TERMS * _LANES * 4)

    partials = pl.pallas_call(
        _loss_kernel,
        grid_spec=grid_spec,
        out_shape=jax.ShapeDtypeStruct((n_blocks, _N_TERMS, _LANES), jnp.float32),
        compiler_params=pltpu.CompilerParams(
            dimension_semantics=("parallel",),
            vmem_limit_bytes=vmem_limit),
        cost_estimate=pl.CostEstimate(flops=int(flops), transcendentals=0,
                                      bytes_accessed=int(bytes_accessed)),
    )(pred, target, lht, rw)

    sums = jnp.sum(partials, axis=(0, 2))        # (_N_TERMS,) final reduction

    n_all = B * C * H * W
    n_y = B * H * W
    n_cbcr = B * 2 * H * W   # F.l1_loss over (B,2,H,W) -> mean over B*2*H*W
    means = {
        "l1": sums[0] / n_all,
        "mse": sums[1] / n_all,
        "invariant_l1": sums[2] / n_all,
        "chroma": sums[3] / n_cbcr,
        "luma": sums[4] / n_y,
        "luma_mse": sums[5] / n_y,
        "frequency": sums[6] / n_all,
        "sharpness_loss": sums[7] / n_all,
    }

    loss = jnp.float32(0.0)
    for name, weight in lambdas.items():
        if weight <= 0:          # matches the reference forward exactly
            continue
        loss = loss + weight * means[name]
    return loss


# --------------------------------------------------------------------------- #
# Pure-JAX reference (original, non-linearized formulation) for validation     #
# --------------------------------------------------------------------------- #
def _reference_loss(pred, target, lambdas):
    B, C, H, W = pred.shape
    dh = jnp.asarray(_dct_matrix(H))
    dw = jnp.asarray(_dct_matrix(W))
    bh = jnp.asarray(_gaussian_blur_matrix(H))
    bw = jnp.asarray(_gaussian_blur_matrix(W))
    hp = jax.lax.Precision.HIGHEST

    def dct2d(x):
        return jnp.einsum('uh,bchw,vw->bcuv', dh, x, dw, precision=hp)

    def blur2d(x):
        return jnp.einsum('uh,bchw,vw->bcuv', bh, x, bw, precision=hp)

    def ycbcr(x):
        r, g, b = x[:, 0], x[:, 1], x[:, 2]
        y = 0.299 * r + 0.587 * g + 0.114 * b
        cb = (b - y) * 0.564 + 0.5
        cr = (r - y) * 0.713 + 0.5
        return jnp.stack([y, cb, cr], axis=1)

    yp, yt = ycbcr(pred), ycbcr(target)
    mean_p = pred.mean(axis=(1, 2, 3), keepdims=True)
    mean_t = target.mean(axis=(1, 2, 3), keepdims=True)
    vals = {
        "l1": jnp.mean(jnp.abs(pred - target)),
        "mse": jnp.mean((pred - target) ** 2),
        "invariant_l1": jnp.mean(jnp.abs((pred - mean_p) - (target - mean_t))),
        "chroma": jnp.mean(jnp.abs(yp[:, 1:] - yt[:, 1:])),
        "luma": jnp.mean(jnp.abs(yp[:, :1] - yt[:, :1])),
        "luma_mse": jnp.mean((yp[:, :1] - yt[:, :1]) ** 2),
        "frequency": jnp.mean(jnp.abs(dct2d(pred) - dct2d(target))),
        "sharpness_loss": jnp.mean(
            jnp.abs((pred - blur2d(pred)) - (target - blur2d(target)))),
    }
    loss = 0.0
    for name, weight in lambdas.items():
        if weight <= 0:
            continue
        loss = loss + weight * vals[name]
    return loss


if __name__ == "__main__":
    key = jax.random.PRNGKey(0)
    kp, kt = jax.random.split(key)
    pred = jax.random.uniform(kp, (2, 3, 16, 16), dtype=jnp.float32)
    target = jax.random.uniform(kt, (2, 3, 16, 16), dtype=jnp.float32)

    lambdas = {
        "l1": 1.0,
        "mse": 0.5,
        "invariant_l1": 0.25,
        "chroma": 0.3,
        "luma": 0.7,
        "luma_mse": 0.2,
        "frequency": 0.1,
        "sharpness_loss": 0.15,
        # need pretrained nets / MS-SSIM (weight <= 0 -> skipped, as in reference):
        "vgg": 0.0, "style": 0.0, "lpips": 0.0,
        "ssim": 0.0, "ssim_coarse": 0.0, "ssim_fine": 0.0, "luma_struct": 0.0,
    }

    loss = jax.block_until_ready(combined_perceptual_loss(pred, target, lambdas))
    assert bool(jnp.isfinite(loss))

    ref = jax.block_until_ready(_reference_loss(pred, target, lambdas))
    # bf16 matmul operands (f32 accumulation) -> ~0.5% worst-case drift on the
    # frequency/sharpness terms; everything else is exact f32.
    assert abs(float(loss) - float(ref)) <= 1e-3 + 2e-2 * abs(float(ref)), (loss, ref)

    print("KERNEL_OK")
</pallas_src>

<mosaic_0001>
module attributes {stable_mosaic.version = 11 : i64} {
  func.func @_loss_kernel(%arg0: i32, %arg1: memref<1x3x16x16xf32, #tpu.memory_space<vmem>>, %arg2: memref<1x3x16x16xf32, #tpu.memory_space<vmem>>, %arg3: memref<2x16x16xbf16, #tpu.memory_space<vmem>>, %arg4: memref<16x32xbf16, #tpu.memory_space<vmem>>, %arg5: memref<1x8x128xf32, #tpu.memory_space<vmem>>) attributes {dimension_semantics = [#tpu.dimension_semantics<parallel>], iteration_bounds = array<i64: 2>, scalar_prefetch = 0 : i64, scratch_operands = 0 : i64, tpu.core_type = #tpu.core_type<tc>, window_params = [{transform_indices = @transform_0, window_bounds = array<i64: 1, 3, 16, 16>}, {transform_indices = @transform_1, window_bounds = array<i64: 1, 3, 16, 16>}, {pipeline_mode = #tpu.pipeline_mode<synchronous>, transform_indices = @transform_2, window_bounds = array<i64: 2, 16, 16>}, {pipeline_mode = #tpu.pipeline_mode<synchronous>, transform_indices = @transform_3, window_bounds = array<i64: 16, 32>}, {transform_indices = @transform_4, window_bounds = array<i64: 1, 8, 128>}]} {
    %c0 = arith.constant 0 : index
    %c0_0 = arith.constant 0 : index
    %c0_1 = arith.constant 0 : index
    %c0_2 = arith.constant 0 : index
    %0 = vector.load %arg1[%c0, %c0_0, %c0_1, %c0_2] : memref<1x3x16x16xf32, #tpu.memory_space<vmem>>, vector<1x3x16x16xf32>
    %c0_3 = arith.constant 0 : index
    %c0_4 = arith.constant 0 : index
    %c0_5 = arith.constant 0 : index
    %c0_6 = arith.constant 0 : index
    %1 = vector.load %arg2[%c0_3, %c0_4, %c0_5, %c0_6] : memref<1x3x16x16xf32, #tpu.memory_space<vmem>>, vector<1x3x16x16xf32>
    %2 = arith.subf %0, %1 : vector<1x3x16x16xf32>
    %3 = math.absf %2 : vector<1x3x16x16xf32>
    %4 = vector.shape_cast %3 : vector<1x3x16x16xf32> to vector<48x16xf32>
    %cst = arith.constant dense<0.000000e+00> : vector<16xf32>
    %5 = vector.multi_reduction <add>, %4, %cst [0] : vector<48x16xf32> to vector<16xf32>
    %6 = vector.shape_cast %5 : vector<16xf32> to vector<1x16xf32>
    %cst_7 = arith.constant 0.000000e+00 : f32
    %7 = vector.broadcast %cst_7 : f32 to vector<1x112xf32>
    %8 = tpu.concatenate %6, %7 in 1 : vector<1x16xf32>, vector<1x112xf32> -> vector<1x128xf32>
    %cst_8 = arith.constant dense<0.000000e+00> : vector<128xf32>
    %9 = vector.multi_reduction <add>, %8, %cst_8 [0] : vector<1x128xf32> to vector<128xf32>
    %10 = vector.shape_cast %9 : vector<128xf32> to vector<1x128xf32>
    %11 = arith.mulf %2, %2 : vector<1x3x16x16xf32>
    %12 = vector.shape_cast %11 : vector<1x3x16x16xf32> to vector<48x16xf32>
    %cst_9 = arith.constant dense<0.000000e+00> : vector<16xf32>
    %13 = vector.multi_reduction <add>, %12, %cst_9 [0] : vector<48x16xf32> to vector<16xf32>
    %14 = vector.shape_cast %13 : vector<16xf32> to vector<1x16xf32>
    %cst_10 = arith.constant 0.000000e+00 : f32
    %15 = vector.broadcast %cst_10 : f32 to vector<1x112xf32>
    %16 = tpu.concatenate %14, %15 in 1 : vector<1x16xf32>, vector<1x112xf32> -> vector<1x128xf32>
    %cst_11 = arith.constant dense<0.000000e+00> : vector<128xf32>
    %17 = vector.multi_reduction <add>, %16, %cst_11 [0] : vector<1x128xf32> to vector<128xf32>
    %18 = vector.shape_cast %17 : vector<128xf32> to vector<1x128xf32>
    %19 = vector.shape_cast %2 : vector<1x3x16x16xf32> to vector<1x1x3x16x16xf32>
    %cst_12 = arith.constant dense<0.000000e+00> : vector<1xf32>
    %20 = vector.multi_reduction <add>, %19, %cst_12 [1, 2, 3, 4] : vector<1x1x3x16x16xf32> to vector<1xf32>
    %21 = vector.shape_cast %20 : vector<1xf32> to vector<1x1x1x1x1xf32>
    %22 = vector.extract %21[0, 0, 0, 0, 0] : f32 from vector<1x1x1x1x1xf32>
    %cst_13 = arith.constant 0.00130208337 : f32
    %23 = arith.mulf %22, %cst_13 : f32
    %24 = vector.broadcast %23 : f32 to vector<1x3x16x16xf32>
    %25 = arith.subf %2, %24 : vector<1x3x16x16xf32>
    %26 = math.absf %25 : vector<1x3x16x16xf32>
    %27 = vector.shape_cast %26 : vector<1x3x16x16xf32> to vector<48x16xf32>
    %cst_14 = arith.constant dense<0.000000e+00> : vector<16xf32>
    %28 = vector.multi_reduction <add>, %27, %cst_14 [0] : vector<48x16xf32> to vector<16xf32>
    %29 = vector.shape_cast %28 : vector<16xf32> to vector<1x16xf32>
    %cst_15 = arith.constant 0.000000e+00 : f32
    %30 = vector.broadcast %cst_15 : f32 to vector<1x112xf32>
    %31 = tpu.concatenate %29, %30 in 1 : vector<1x16xf32>, vector<1x112xf32> -> vector<1x128xf32>
    %cst_16 = arith.constant dense<0.000000e+00> : vector<128xf32>
    %32 = vector.multi_reduction <add>, %31, %cst_16 [0] : vector<1x128xf32> to vector<128xf32>
    %33 = vector.shape_cast %32 : vector<128xf32> to vector<1x128xf32>
    %34 = vector.extract_strided_slice %2 {offsets = [0, 0, 0, 0], sizes = [1, 1, 16, 16], strides = [1, 1, 1, 1]} : vector<1x3x16x16xf32> to vector<1x1x16x16xf32>
    %35 = vector.shape_cast %34 : vector<1x1x16x16xf32> to vector<1x16x16xf32>
    %36 = vector.extract_strided_slice %2 {offsets = [0, 1, 0, 0], sizes = [1, 1, 16, 16], strides = [1, 1, 1, 1]} : vector<1x3x16x16xf32> to vector<1x1x16x16xf32>
    %37 = vector.shape_cast %36 : vector<1x1x16x16xf32> to vector<1x16x16xf32>
    %38 = vector.extract_strided_slice %2 {offsets = [0, 2, 0, 0], sizes = [1, 1, 16, 16], strides = [1, 1, 1, 1]} : vector<1x3x16x16xf32> to vector<1x1x16x16xf32>
    %39 = vector.shape_cast %38 : vector<1x1x16x16xf32> to vector<1x16x16xf32>
    %cst_17 = arith.constant 2.990000e-01 : f32
    %40 = vector.broadcast %cst_17 : f32 to vector<1x16x16xf32>
    %41 = arith.mulf %40, %35 : vector<1x16x16xf32>
    %cst_18 = arith.constant 5.870000e-01 : f32
    %42 = vector.broadcast %cst_18 : f32 to vector<1x16x16xf32>
    %43 = arith.mulf %42, %37 : vector<1x16x16xf32>
    %44 = arith.addf %41, %43 : vector<1x16x16xf32>
    %cst_19 = arith.constant 1.140000e-01 : f32
    %45 = vector.broadcast %cst_19 : f32 to vector<1x16x16xf32>
    %46 = arith.mulf %45, %39 : vector<1x16x16xf32>
    %47 = arith.addf %44, %46 : vector<1x16x16xf32>
    %48 = arith.subf %39, %47 : vector<1x16x16xf32>
    %cst_20 = arith.constant 5.640000e-01 : f32
    %49 = vector.broadcast %cst_20 : f32 to vector<1x16x16xf32>
    %50 = arith.mulf %48, %49 : vector<1x16x16xf32>
    %51 = arith.subf %35, %47 : vector<1x16x16xf32>
    %cst_21 = arith.constant 0.712999999 : f32
    %52 = vector.broadcast %cst_21 : f32 to vector<1x16x16xf32>
    %53 = arith.mulf %51, %52 : vector<1x16x16xf32>
    %54 = math.absf %47 : vector<1x16x16xf32>
    %55 = vector.shape_cast %54 : vector<1x16x16xf32> to vector<16x16xf32>
    %cst_22 = arith.constant dense<0.000000e+00> : vector<16xf32>
    %56 = vector.multi_reduction <add>, %55, %cst_22 [0] : vector<16x16xf32> to vector<16xf32>
    %57 = vector.shape_cast %56 : vector<16xf32> to vector<1x16xf32>
    %cst_23 = arith.constant 0.000000e+00 : f32
    %58 = vector.broadcast %cst_23 : f32 to vector<1x112xf32>
    %59 = tpu.concatenate %57, %58 in 1 : vector<1x16xf32>, vector<1x112xf32> -> vector<1x128xf32>
    %cst_24 = arith.constant dense<0.000000e+00> : vector<128xf32>
    %60 = vector.multi_reduction <add>, %59, %cst_24 [0] : vector<1x128xf32> to vector<128xf32>
    %61 = vector.shape_cast %60 : vector<128xf32> to vector<1x128xf32>
    %62 = arith.mulf %47, %47 : vector<1x16x16xf32>
    %63 = vector.shape_cast %62 : vector<1x16x16xf32> to vector<16x16xf32>
    %cst_25 = arith.constant dense<0.000000e+00> : vector<16xf32>
    %64 = vector.multi_reduction <add>, %63, %cst_25 [0] : vector<16x16xf32> to vector<16xf32>
    %65 = vector.shape_cast %64 : vector<16xf32> to vector<1x16xf32>
    %cst_26 = arith.constant 0.000000e+00 : f32
    %66 = vector.broadcast %cst_26 : f32 to vector<1x112xf32>
    %67 = tpu.concatenate %65, %66 in 1 : vector<1x16xf32>, vector<1x112xf32> -> vector<1x128xf32>
    %cst_27 = arith.constant dense<0.000000e+00> : vector<128xf32>
    %68 = vector.multi_reduction <add>, %67, %cst_27 [0] : vector<1x128xf32> to vector<128xf32>
    %69 = vector.shape_cast %68 : vector<128xf32> to vector<1x128xf32>
    %70 = math.absf %50 : vector<1x16x16xf32>
    %71 = vector.shape_cast %70 : vector<1x16x16xf32> to vector<16x16xf32>
    %cst_28 = arith.constant dense<0.000000e+00> : vector<16xf32>
    %72 = vector.multi_reduction <add>, %71, %cst_28 [0] : vector<16x16xf32> to vector<16xf32>
    %73 = vector.shape_cast %72 : vector<16xf32> to vector<1x16xf32>
    %cst_29 = arith.constant 0.000000e+00 : f32
    %74 = vector.broadcast %cst_29 : f32 to vector<1x112xf32>
    %75 = tpu.concatenate %73, %74 in 1 : vector<1x16xf32>, vector<1x112xf32> -> vector<1x128xf32>
    %cst_30 = arith.constant dense<0.000000e+00> : vector<128xf32>
    %76 = vector.multi_reduction <add>, %75, %cst_30 [0] : vector<1x128xf32> to vector<128xf32>
    %77 = vector.shape_cast %76 : vector<128xf32> to vector<1x128xf32>
    %78 = math.absf %53 : vector<1x16x16xf32>
    %79 = vector.shape_cast %78 : vector<1x16x16xf32> to vector<16x16xf32>
    %cst_31 = arith.constant dense<0.000000e+00> : vector<16xf32>
    %80 = vector.multi_reduction <add>, %79, %cst_31 [0] : vector<16x16xf32> to vector<16xf32>
    %81 = vector.shape_cast %80 : vector<16xf32> to vector<1x16xf32>
    %cst_32 = arith.constant 0.000000e+00 : f32
    %82 = vector.broadcast %cst_32 : f32 to vector<1x112xf32>
    %83 = tpu.concatenate %81, %82 in 1 : vector<1x16xf32>, vector<1x112xf32> -> vector<1x128xf32>
    %cst_33 = arith.constant dense<0.000000e+00> : vector<128xf32>
    %84 = vector.multi_reduction <add>, %83, %cst_33 [0] : vector<1x128xf32> to vector<128xf32>
    %85 = vector.shape_cast %84 : vector<128xf32> to vector<1x128xf32>
    %86 = arith.addf %77, %85 : vector<1x128xf32>
    %87 = vector.shape_cast %2 : vector<1x3x16x16xf32> to vector<48x16xf32>
    %88 = arith.truncf %87 : vector<48x16xf32> to vector<48x16xbf16>
    %c0_34 = arith.constant 0 : index
    %c0_35 = arith.constant 0 : index
    %89 = vector.load %arg4[%c0_34, %c0_35] : memref<16x32xbf16, #tpu.memory_space<vmem>>, vector<16x32xbf16>
    %cst_36 = arith.constant dense<0.000000e+00> : vector<48x32xf32>
    %90 = tpu.matmul %88, %89, %cst_36 {dimension_numbers = #tpu.dot_dimension_numbers<[1], [0], [0], [1], [0, 0, 1, 1], [], []>} : vector<48x16xbf16>, vector<16x32xbf16>, vector<48x32xf32> -> vector<48x32xf32>
    %91 = vector.shape_cast %90 : vector<48x32xf32> to vector<3x16x32xf32>
    %92 = vector.extract_strided_slice %91 {offsets = [0, 0, 0], sizes = [3, 16, 16], strides = [1, 1, 1]} : vector<3x16x32xf32> to vector<3x16x16xf32>
    %93 = tpu.transpose %92, [0, 2, 1] : vector<3x16x16xf32> -> vector<3x16x16xf32>
    %94 = vector.shape_cast %93 : vector<3x16x16xf32> to vector<48x16xf32>
    %95 = arith.truncf %94 : vector<48x16xf32> to vector<48x16xbf16>
    %96 = vector.extract_strided_slice %91 {offsets = [0, 0, 16], sizes = [3, 16, 16], strides = [1, 1, 1]} : vector<3x16x32xf32> to vector<3x16x16xf32>
    %97 = tpu.transpose %96, [0, 2, 1] : vector<3x16x16xf32> -> vector<3x16x16xf32>
    %98 = vector.shape_cast %97 : vector<3x16x16xf32> to vector<48x16xf32>
    %99 = arith.truncf %98 : vector<48x16xf32> to vector<48x16xbf16>
    %c0_37 = arith.constant 0 : index
    %c0_38 = arith.constant 0 : index
    %c0_39 = arith.constant 0 : index
    %100 = vector.load %arg3[%c0_37, %c0_38, %c0_39] : memref<2x16x16xbf16, #tpu.memory_space<vmem>>, vector<1x16x16xbf16>
    %101 = vector.shape_cast %100 : vector<1x16x16xbf16> to vector<16x16xbf16>
    %cst_40 = arith.constant dense<0.000000e+00> : vector<48x16xf32>
    %102 = tpu.matmul %95, %101, %cst_40 {dimension_numbers = #tpu.dot_dimension_numbers<[1], [0], [0], [1], [0, 0, 1, 1], [], []>} : vector<48x16xbf16>, vector<16x16xbf16>, vector<48x16xf32> -> vector<48x16xf32>
    %c1 = arith.constant 1 : index
    %c0_41 = arith.constant 0 : index
    %c0_42 = arith.constant 0 : index
    %103 = vector.load %arg3[%c1, %c0_41, %c0_42] : memref<2x16x16xbf16, #tpu.memory_space<vmem>>, vector<1x16x16xbf16>
    %104 = vector.shape_cast %103 : vector<1x16x16xbf16> to vector<16x16xbf16>
    %cst_43 = arith.constant dense<0.000000e+00> : vector<48x16xf32>
    %105 = tpu.matmul %99, %104, %cst_43 {dimension_numbers = #tpu.dot_dimension_numbers<[1], [0], [0], [1], [0, 0, 1, 1], [], []>} : vector<48x16xbf16>, vector<16x16xbf16>, vector<48x16xf32> -> vector<48x16xf32>
    %106 = math.absf %102 : vector<48x16xf32>
    %cst_44 = arith.constant dense<0.000000e+00> : vector<16xf32>
    %107 = vector.multi_reduction <add>, %106, %cst_44 [0] : vector<48x16xf32> to vector<16xf32>
    %108 = vector.shape_cast %107 : vector<16xf32> to vector<1x16xf32>
    %cst_45 = arith.constant 0.000000e+00 : f32
    %109 = vector.broadcast %cst_45 : f32 to vector<1x112xf32>
    %110 = tpu.concatenate %108, %109 in 1 : vector<1x16xf32>, vector<1x112xf32> -> vector<1x128xf32>
    %cst_46 = arith.constant dense<0.000000e+00> : vector<128xf32>
    %111 = vector.multi_reduction <add>, %110, %cst_46 [0] : vector<1x128xf32> to vector<128xf32>
    %112 = vector.shape_cast %111 : vector<128xf32> to vector<1x128xf32>
    %113 = vector.shape_cast %2 : vector<1x3x16x16xf32> to vector<3x16x16xf32>
    %114 = tpu.transpose %113, [0, 2, 1] : vector<3x16x16xf32> -> vector<3x16x16xf32>
    %115 = vector.shape_cast %114 : vector<3x16x16xf32> to vector<48x16xf32>
    %116 = arith.subf %115, %105 : vector<48x16xf32>
    %117 = math.absf %116 : vector<48x16xf32>
    %cst_47 = arith.constant dense<0.000000e+00> : vector<16xf32>
    %118 = vector.multi_reduction <add>, %117, %cst_47 [0] : vector<48x16xf32> to vector<16xf32>
    %119 = vector.shape_cast %118 : vector<16xf32> to vector<1x16xf32>
    %cst_48 = arith.constant 0.000000e+00 : f32
    %120 = vector.broadcast %cst_48 : f32 to vector<1x112xf32>
    %121 = tpu.concatenate %119, %120 in 1 : vector<1x16xf32>, vector<1x112xf32> -> vector<1x128xf32>
    %cst_49 = arith.constant dense<0.000000e+00> : vector<128xf32>
    %122 = vector.multi_reduction <add>, %121, %cst_49 [0] : vector<1x128xf32> to vector<128xf32>
    %123 = vector.shape_cast %122 : vector<128xf32> to vector<1x128xf32>
    %124 = tpu.concatenate %10, %18, %33, %86, %61, %69, %112, %123 in 0 : vector<1x128xf32>, vector<1x128xf32>, vector<1x128xf32>, vector<1x128xf32>, vector<1x128xf32>, vector<1x128xf32>, vector<1x128xf32>, vector<1x128xf32> -> vector<8x128xf32>
    %c0_50 = arith.constant 0 : index
    %c0_51 = arith.constant 0 : index
    %c0_52 = arith.constant 0 : index
    %125 = vector.load %arg5[%c0_50, %c0_51, %c0_52] : memref<1x8x128xf32, #tpu.memory_space<vmem>>, vector<1x8x128xf32>
    %126 = vector.shape_cast %125 : vector<1x8x128xf32> to vector<8x128xf32>
    %127 = vector.shape_cast %124 : vector<8x128xf32> to vector<1x8x128xf32>
    tpu.vector_store %arg5[%c0_50, %c0_51, %c0_52], %127 {strides = array<i32>} : memref<1x8x128xf32, #tpu.memory_space<vmem>>, vector<1x8x128xf32>,
    return
  }
  func.func @transform_0(%arg0: i32) -> (i32, i32, i32, i32) {
    %c0_i32 = arith.constant 0 : i32
    %c0_i32_0 = arith.constant 0 : i32
    %c0_i32_1 = arith.constant 0 : i32
    %c0_i32_2 = arith.constant 0 : i32
    return %arg0, %c0_i32, %c0_i32_0, %c0_i32_1 : i32, i32, i32, i32
  }
  func.func @transform_1(%arg0: i32) -> (i32, i32, i32, i32) {
    %c0_i32 = arith.constant 0 : i32
    %c0_i32_0 = arith.constant 0 : i32
    %c0_i32_1 = arith.constant 0 : i32
    %c0_i32_2 = arith.constant 0 : i32
    return %arg0, %c0_i32, %c0_i32_0, %c0_i32_1 : i32, i32, i32, i32
  }
  func.func @transform_2(%arg0: i32) -> (i32, i32, i32) {
    %c0_i32 = arith.constant 0 : i32
    %c0_i32_0 = arith.constant 0 : i32
    %c0_i32_1 = arith.constant 0 : i32
    %c0_i32_2 = arith.constant 0 : i32
    return %c0_i32, %c0_i32_0, %c0_i32_1 : i32, i32, i32
  }
  func.func @transform_3(%arg0: i32) -> (i32, i32) {
    %c0_i32 = arith.constant 0 : i32
    %c0_i32_0 = arith.constant 0 : i32
    %c0_i32_1 = arith.constant 0 : i32
    return %c0_i32, %c0_i32_0 : i32, i32
  }
  func.func @transform_4(%arg0: i32) -> (i32, i32, i32) {
    %c0_i32 = arith.constant 0 : i32
    %c0_i32_0 = arith.constant 0 : i32
    %c0_i32_1 = arith.constant 0 : i32
    return %arg0, %c0_i32, %c0_i32_0 : i32, i32, i32
  }
}

</mosaic_0001>

<bundles_post_ra>
// kernel: tpu_custom_call.1
= control target key start
LH: loop header
LB: loop body
LE: loop exit
PB: predicated region body
PF: predicated region fallthrough
CT: control target
= control target key end

     0   :  { %s1854_s0 = inlined_call_operand.hbm [shape: f32[2,3,16,16], index: 0, kind: input, shape index: {}]   ;;  %s1855_s1 = inlined_call_operand.hbm [shape: f32[2,3,16,16], index: 1, kind: input, shape index: {}]   ;;  %s1856_s2 = inlined_call_operand.hbm [shape: bf16[2,16,16], index: 2, kind: input, shape index: {}]   ;;  %s1857_s3 = inlined_call_operand.hbm [shape: bf16[16,32], index: 3, kind: input, shape index: {}]   ;;  %s1858_s4 = inlined_call_operand.hbm [shape: f32[2,8,128], index: 4, kind: output, shape index: {}]  }
   0x1   :  { %1860 = sst [smem:[#allocation17_spill]] %s1856_s2 }
   0x2   :  { %1861 = sst [smem:[#allocation18_spill]] %s1857_s3 }
   0x3   :  { %9 = vsyncpa [#allocation3], 0 }
   0x4   :  { %11 = vsyncpa [#allocation3 + $0x1], 0 }
   0x5   :  { %12 = vsyncpa [#allocation6], 0 }
   0x6   :  { %14 = vsyncpa [#allocation6 + $0x1], 0 }
   0x7   :  { %15 = vsyncpa [#allocation9], 0 }
   0x8   :  { %16 = vsyncpa [#allocation4], 0 }
   0x9   :  { %18 = vsyncpa [#allocation4 + $0x1], 0  ;;  %s1528_s15 = smov 0   ;;  %s1530_s16 = smov 0  }
   0xa   :  { %s1532_s17 = smov 0   ;;  %s1534_s18 = smov 0  }
   0xb LB: > { %s1549_s19 = sadd.s32 4294967295, %s1494_s18   ;;  %s1152_s20 = sadd.s32 4294967294, %s1494_s18   ;;  %s1494_s18 = sphi %s1534_s18, %s1876_s18   ;;  %s1490_s17 = sphi %s1532_s17, %s1875_s17   ;;  %s1486_s16 = sphi %s1530_s16, %s1874_s16   ;;  %s1482_s15 = sphi %s1528_s15, %s1873_s15  }
   0xc   : > { %p44_p0 = scmp.ne.s32.totalorder %s1486_s16, %s1482_s15  ;;  %p45_p1 = scmp.eq.s32.totalorder %s1549_s19, 0 }
   0xd   : > { %p136_p2 = scmp.eq.s32.totalorder %s1549_s19, 1  ;;  %p142_p3 = scmp.eq.s32.totalorder %s1152_s20, 1 }
   0xe   : > { %p1558_p4 = por %p45_p1, %p44_p0  ;;  %p1153_p5 = scmp.ge.s32.totalorder %s1494_s18, 1 }
   0xf   : > { %p1563_p6 = por %p142_p3, %p44_p0  ;;  %p149_p7 = scmp.lt.s32.totalorder %s1494_s18, 3 }
  0x10   : > { %s1864_s2 = sld [smem:[#allocation17_spill]]  ;;  %s1496_s27 = smov [#allocation7]  }
  0x11   : > { %p1571_p8 = pnand %p1153_p5, %p149_p7  ;;  %s162_s28 = sshll.u32 %s1496_s27, 4  ;;  %s163_s28 = int_to_ptr.vmem [resolvable:$true] %s162_s28 }
  0x12   : > { %s1866_s3 = sld [smem:[#allocation18_spill]]  ;;  %s1497_s6 = smov 64  }
  0x13   : > { %p1213_p9 = pneg %p1571_p8  ;;  %s1498_s7 = smov 4  }
  0x14   : > { %s1499_s8 = smov [#allocation8]   ;;  %s1584_s10 = sadd.s32 1, %s1494_s18  }
  0x15   : > { %p1214_p10 = pnand %p1213_p9, %p45_p1  ;;  %s176_s9 = sshll.u32 %s1499_s8, 4  ;;  %s177_s9 = int_to_ptr.vmem [resolvable:$true] %s176_s9 }
  0x16   : > { %s160_s25 = sshll.u32 %s1864_s2, 4  ;;  %s31_s11 = sadd.s32 1, %s1490_s17  ;;  %s161_s25 = int_to_ptr.hbm [resolvable:$true] %s160_s25 }
  0x17   : > { %1216 = dma.hbm_to_vmem [thread:$0]  (!%p1214_p10), %s161_s25, 256, %s163_s28, [#allocation6], %s1497_s6, %s1497_s6, %s1498_s7  }
  0x18   : > { %s174_s5 = sshll.u32 %s1866_s3, 4  ;;  %s28_s12 = ssub.s32 %s1494_s18, %s1584_s10  ;;  %s175_s5 = int_to_ptr.hbm [resolvable:$true] %s174_s5 }
  0x19   : > { %1219 = dma.hbm_to_vmem [thread:$0]  (!%p1214_p10), %s175_s5, 128, %s177_s9, [#allocation9], %s1497_s6, %s1497_s6, %s1498_s7  }
  0x1a   : > { %p38_p12 = scmp.ne.s32.totalorder %s1490_s17, %s1486_s16  ;;  %p29_p13 = scmp.eq.s32.totalorder %s28_s12, 0 }
  0x1b   : > { %p39_p0 = scmp.eq.s32.totalorder %s1494_s18, 0  ;;  %p1233_p5 = scmp.lt.s32.totalorder %s1494_s18, 2 }
  0x1c   : > { %p1594_p3 = por %p136_p2, %p38_p12  ;;  %s190_s20 = sand.u32 1, %s1490_s17  }
  0x1d   : > { %s1600_s14 = scalar_select %p29_p13, %s1490_s17, %s31_s11  }
  0x1e   : > { %p40_p7 = por %p39_p0, %p38_p12  ;;  %s1603_s23 = smul.u32 48, %s190_s20 }
  0x1f   : > { %1868 = sst [smem:[#allocation16_spill]] %s1600_s14  ;;  %s1859_s24 = smul.u32 48, %s1494_s18 }
  0x20   : > { %p1606_p9 = pnand %p1233_p5, %p40_p7  ;;  %s194_s30 = scalar_lea.vmem [#allocation2], %s1603_s23 }
  0x21   : > { %s199_s29 = scalar_lea.hbm %s1854_s0, %s1859_s24  ;;  %s202_s5 = sshll.u32 %s194_s30, 4  ;;  %s203_s5 = int_to_ptr.vmem [resolvable:$true] %s202_s5 }
  0x22   : > { %s200_s6 = sshll.u32 %s199_s29, 4  ;;  %s212_s7 = sand.u32 1, %s1494_s18   ;;  %s201_s6 = int_to_ptr.hbm [resolvable:$true] %s200_s6 }
  0x23   : > { %s191_s8 = scalar_lea.sflag [#allocation3], %s190_s20  ;;  %s1356_s9 = sshra.s32 %s201_s6, 4  ;;  %s1357_s9 = int_to_ptr.hbm [resolvable:$true] %s1356_s9 }
  0x24   : > { %s1358_s11 = scalar_lea.hbm %s1357_s9, 48  ;;  %p1360_p10 = pneg %p1606_p9 }
  0x25   : > { %p1359_p2 = scmp.ne.s32.totalorder %s1357_s9, %s1358_s11  ;;  %s1363_s28 = scalar_lea.hbm %s1854_s0, 96 }
  0x26   : > { %p1364_p0 = scmp.lt.s32.totalorder %s1357_s9, %s1854_s0  ;;  %p1365_p5 = scmp.lt.s32.totalorder %s1363_s28, %s1358_s11 }
  0x27   : > { %p1361_p12 = pnand %p1360_p10, %p1359_p2 }
  0x28   : > { %p1366_p7 = por %p1365_p5, %p1364_p0 }
  0x29   : > { %p1362_p13 = pneg %p1361_p12 }
  0x2b   : > { %p1367_p11 = pnand %p1366_p7, %p1362_p13 }
  0x2d   : > { %1370 = shalt.err (!%p1367_p11)
}
  0x2e   : > { %s1500_s20 = smov 128   ;;  %s1501_s24 = smov 8  }
  0x2f   : > { %1223 = dma.hbm_to_vmem [thread:$0]  (!%p1606_p9), %s201_s6, 768, %s203_s5, %s191_s8, %s1500_s20, %s1500_s20, %s1501_s24  }
  0x30   : > { %s1870_s2 = smul.u32 48, %s1494_s18  ;;  %s216_s14 = scalar_lea.vmem [#allocation5], %s1603_s23 }
  0x31   : > { %s224_s30 = sshll.u32 %s216_s14, 4  ;;  %s213_s11 = scalar_lea.sflag [#allocation6], %s212_s7  ;;  %s225_s30 = int_to_ptr.vmem [resolvable:$true] %s224_s30 }
  0x32   : > { %s221_s27 = scalar_lea.hbm %s1855_s1, %s1870_s2  ;;  %s1393_s8 = scalar_lea.hbm %s1855_s1, 96 }
  0x33   : > { %s222_s9 = sshll.u32 %s221_s27, 4  ;;  %s223_s9 = int_to_ptr.hbm [resolvable:$true] %s222_s9 }
  0x34   : > { %s1386_s28 = sshra.s32 %s223_s9, 4  ;;  %s1387_s28 = int_to_ptr.hbm [resolvable:$true] %s1386_s28 }
  0x35   : > { %s1388_s29 = scalar_lea.hbm %s1387_s28, 48  ;;  %p1394_p13 = scmp.lt.s32.totalorder %s1387_s28, %s1855_s1 }
  0x36   : > { %p1389_p11 = scmp.ne.s32.totalorder %s1387_s28, %s1388_s29  ;;  %p1395_p0 = scmp.lt.s32.totalorder %s1393_s8, %s1388_s29 }
  0x38   : > { %p1391_p2 = pnand %p1389_p11, %p1360_p10  ;;  %p1396_p5 = por %p1395_p0, %p1394_p13 }
  0x3a   : > { %p1392_p12 = pneg %p1391_p2 }
  0x3c   : > { %p1397_p7 = pnand %p1396_p5, %p1392_p12 }
  0x3e   : > { %1400 = shalt.err (!%p1397_p7)
}
  0x3f   : > { %1226 = dma.hbm_to_vmem [thread:$0]  (!%p1606_p9), %s223_s9, 768, %s225_s30, %s213_s11, %s1500_s20, %s1500_s20, %s1501_s24  }
  0x40   : > { %236 = sbr.rel (%p1571_p8) target bundleno = 689 (0x2b1), region = 36  ;;  %s1650_s14 = sand.u32 (!%p1571_p8), 1, %s1486_s16  }
  0x41   : > { %s1196_s23 = smul.u32 (!%p1571_p8), 48, %s1650_s14  ;;  %s239_s7 = scalar_lea.sflag (!%p1571_p8), [#allocation3], %s1650_s14 }
  0x43   : > { %s1654_s12 = scalar_lea.vmem (!%p1571_p8), [#allocation2], %s1196_s23 }
  0x45   : > { %1461 = dma.done.wait (%p1558_p4), %s239_s7, 768  }
  0x46   : > { %1463 = vsyncadd (%p1558_p4), %s239_s7, 4294966528  ;;  %s248_s24 = sand.u32 1, %s1549_s19   ;;  %s252_s25 = scalar_lea.vmem [#allocation5], %s1196_s23 }
  0x47   : > { %s249_s26 = scalar_lea.sflag [#allocation6], %s248_s24 }
  0x48   : > { %1465 = dma.done.wait (%p1558_p4), %s249_s26, 768  }
  0x49   : > { %1467 = vsyncadd (%p1558_p4), %s249_s26, 4294966528 }
  0x4a   : > { %1469 = dma.done.wait (%p45_p1), [#allocation6], 256  }
  0x4b   : > { %1471 = vsyncadd (%p45_p1), [#allocation6], 4294967040 }
  0x4c   : > { %1473 = dma.done.wait (%p45_p1), [#allocation9], 128  }
  0x4d   : > { %1475 = vsyncadd (%p45_p1), [#allocation9], 4294967168  ;;  %v1188_v0 = vld [vmem:[#allocation8] sm:$0xff]  ;;  %v295_v2 = vld [vmem:[%s1654_s12 + $0x8] sm:$0xff]  ;;  %vm318_vm0 = vcmask 130048   ;;  %s1502_s21 = smov 112  }
  0x4e   : > { %v294_v1 = vld [vmem:[%s1654_s12] sm:$0xff]  ;;  %v301_v4 = vld [vmem:[%s252_s25 + $0x8] sm:$0xff]  ;;  %v296_v5 = vld [vmem:[%s1654_s12 + $0x10] sm:$0xff]  ;;  %514 = vmatpush.bf16.msra.mxu0 %v1188_v0  ;;  %1191 = vmatpush.bf16.msra.mxu3 %v1188_v0  ;;  %vm1009_vm1 = vcmask 1040384   ;;  %vm1011_vm2 = vcmask 1041408   ;;  %vm1013_vm3 = vcmask 1042432  }
  0x4f   : > { %v300_v3 = vld [vmem:[%s252_s25] sm:$0xff]  ;;  %v1678_v7 = vsub.f32 %v295_v2, %v301_v4  ;;  %v297_v8 = vld [vmem:[%s1654_s12 + $0x18] sm:$0xff]  ;;  %v302_v9 = vld [vmem:[%s252_s25 + $0x10] sm:$0xff]  ;;  %s1162_s30 = sshll.u32 %s1650_s14, 3  ;;  %vm1015_vm4 = vcmask 1043456   ;;  %s1185_s9 = sshll.u32 %s1549_s19, 3 }
  0x50   : > { %v1676_v6 = vsub.f32 %v294_v1, %v300_v3  ;;  %v303_v10 = vld [vmem:[%s252_s25 + $0x18] sm:$0xff]  ;;  %v1681_v11 = vsub.f32 %v296_v5, %v302_v9  ;;  %v298_v15 = vld [vmem:[%s1654_s12 + $0x20] sm:$0xff]  ;;  %v299_v16 = vld [vmem:[%s1654_s12 + $0x28] sm:$0xff]  ;;  %vm1017_vm5 = vcmask 1044480   ;;  %s1035_s29 = scalar_lea.hbm %s1858_s4, %s1185_s9  ;;  %vm1019_vm6 = vcmask 1045504   ;;  %s292_s5 = scalar_lea.vmem [#allocation10], %s1162_s30 }
  0x51   : > { %v1683_v12 = vsub.f32 %v297_v8, %v303_v10  ;;  %v304_v17 = vld [vmem:[%s252_s25 + $0x20] sm:$0xff]  ;;  %v305_v18 = vld [vmem:[%s252_s25 + $0x28] sm:$0xff]  ;;  %v364_v41 = vsel %vm318_vm0, %v1678_v7, 0.0  ;;  %s1037_s6 = sshll.u32 %s292_s5, 4  ;;  %s1039_s8 = sshll.u32 %s1035_s29, 4  ;;  %vm1021_vm7 = vcmask 1046528   ;;  %s1038_s6 = int_to_ptr.vmem [resolvable:$true] %s1037_s6  ;;  %s1040_s8 = int_to_ptr.hbm [resolvable:$true] %s1039_s8 }
  0x52   : > { %v487_v13 = vpack.c.bf16 %v1678_v7, %v1676_v6  ;;  %v1693_v19 = vsub.f32 %v298_v15, %v304_v17  ;;  %v1695_v20 = vsub.f32 %v299_v16, %v305_v18  ;;  %v1189_v38 = vld [vmem:[#allocation7] sm:$0xff]  ;;  %v363_v40 = vsel %vm318_vm0, %v1676_v6, 0.0  ;;  %v1190_v46 = vld [vmem:[#allocation7 + $0x8] sm:$0xff]  ;;  %s1025_s19 = scalar_lea.sflag [#allocation4], %s1650_s14  ;;  %s1430_s3 = sshra.s32 %s1040_s8, 4  ;;  %s1431_s3 = int_to_ptr.hbm [resolvable:$true] %s1430_s3 }
  0x53   : > { %v488_v14 = vpack.c.bf16 %v1683_v12, %v1681_v11  ;;  %777 = vmatpush.bf16.msra.mxu1 %v1189_v38  ;;  %v365_v42 = vadd.f32 %v364_v41, %v363_v40  ;;  %v366_v43 = vsel %vm318_vm0, %v1681_v11, 0.0  ;;  %v368_v47 = vsel %vm318_vm0, %v1683_v12, 0.0  ;;  %819 = vmatpush.bf16.msra.mxu2 %v1190_v46  ;;  %s1432_s2 = scalar_lea.hbm %s1431_s3, 8  ;;  %s1436_s12 = scalar_lea.hbm %s1858_s4, 16 }
  0x54   : > { %1167 = vmatmul.msk.bf16.vlgmr.msra.gmra.mxu0 %vm318_vm0, %v487_v13  ;;  %v489_v21 = vpack.c.bf16 %v1695_v20, %v1693_v19  ;;  %v370_v50 = vsel %vm318_vm0, %v1693_v19, 0.0  ;;  %v372_v52 = vsel %vm318_vm0, %v1695_v20, 0.0  ;;  %v416_v18 = vmul.f32 0.299, %v1676_v6  ;;  %p1433_p1 = scmp.ne.s32.totalorder %s1431_s3, %s1432_s2  ;;  %p1437_p9 = scmp.lt.s32.totalorder %s1431_s3, %s1858_s4 }
  0x55   : > { %1168 = vmatmul.msk.bf16.vlgmr.msra.gmra.mxu3 %vm318_vm0, %v488_v14  ;;  %v367_v44 = vadd.f32 %v366_v43, %v365_v42  ;;  %v314_v38 = vand.u32 2147483647, %v1681_v11  ;;  %v341_v41 = vmul.f32 %v1683_v12, %v1683_v12  ;;  %v315_v46 = vand.u32 2147483647, %v1683_v12  ;;  %p1438_p10 = scmp.lt.s32.totalorder %s1436_s12, %s1432_s2 }
  0x56   : > { %p1434_p4 = pnand %p1433_p1, %p1594_p3 }
  0x57   : > { %v369_v49 = vadd.f32 %v368_v47, %v367_v44  ;;  %v322_v47 = vsel %vm318_vm0, %v314_v38, 0.0  ;;  %p1439_p11 = por %p1438_p10, %p1437_p9 }
  0x58   : > { %p1435_p8 = pneg %p1434_p4 }
  0x59   : > { %v371_v51 = vadd.f32 %v370_v50, %v369_v49  ;;  %v342_v49 = vmul.f32 %v1693_v19, %v1693_v19 }
  0x5a   : > { %p1440_p2 = pnand %p1439_p11, %p1435_p8 }
  0x5b   : > { %v373_v53 = vadd.f32 %v372_v52, %v371_v51  ;;  %v316_v52 = vand.u32 2147483647, %v1693_v19 }
  0x65   : > { %1169 = vmatmul.msk.bf16.gmra.mxu3 %vm318_vm0, %v489_v21  ;;  %v417_v21 = vmul.f32 0.299, %v1678_v7 }
  0xd1   : > { %v516_v22 = vpop.f32.mrf.mxu0 }
  0xd2   : > { %636 = vrot.lane.b32.xlu0 %v516_v22, %s1502_s21 }
  0xd8   : > { %v521_v23 = vpop.f32.mrf.mxu3 }
  0xd9   : > { %640 = vrot.lane.b32.xlu1 %v521_v23, %s1502_s21  ;;  %v518_v24 = vpop.f32.mrf.mxu0 }
  0xda   : > { %638 = vrot.lane.b32.xlu0 %v518_v24, %s1502_s21 }
  0xe0   : > { %v523_v25 = vpop.f32.mrf.mxu3 }
  0xe1   : > { %642 = vrot.lane.b32.xlu1 %v523_v25, %s1502_s21 }
  0xe8   : > { %v526_v26 = vpop.f32.mrf.mxu3 }
  0xf0   : > { %v528_v27 = vpop.f32.mrf.mxu3 }
  0xf1   : > { %v1277_v28 = vpack.i.bf16 %v528_v27, %v526_v26 }
  0xf3   : > { %1278 = vrot.lane.b32.xlu2 %v1277_v28, %s1502_s21  ;;  %v422_v28 = vmul.f32 0.114, %v1693_v19 }
  0xfc   : > { %531 = vxpose.xlu0.b32.start [1/2] (short) (narrow) %v516_v22, 16  ;;  %v418_v22 = vmul.f32 0.587, %v1681_v11 }
 0x104   : > { %532 = vxpose.xlu0.b32.end [2/2] (short) (narrow) %v518_v24, 16  ;;  %v419_v24 = vmul.f32 0.587, %v1683_v12 }
 0x144   : > { %v637_v29 = vpop.permute.xlu0 %636 }
 0x145   : > { %654 = vxpose.xlu2.b32.start [1/2] (short) (narrow) %v637_v29, 16  ;;  %v421_v29 = vadd.f32 %v419_v24, %v417_v21 }
 0x14b   : > { %v641_v30 = vpop.permute.xlu1 %640 }
 0x14c   : > { %686 = vxpose.xlu1.b32.start [1/2] (short) (narrow) %v641_v30, 16  ;;  %v639_v31 = vpop.permute.xlu0 %638  ;;  %v423_v30 = vmul.f32 0.114, %v1695_v20 }
 0x14d   : > { %v1279_v32 = vpop.permute.xlu2 %1278  ;;  %655 = vxpose.xlu2.b32.end [2/2] (short) (narrow) %v639_v31, 16  ;;  %v312_v31 = vand.u32 2147483647, %v1676_v6 }
 0x14e   : > { %v1280_v33 = vunpack.i.l.bf16 %v1279_v32  ;;  %v1281_v36 = vunpack.i.h.bf16 %v1279_v32  ;;  %v313_v32 = vand.u32 2147483647, %v1678_v7 }
 0x150   : > { %v1282_v34 = vpack.i.bf16 %v526_v26, %v1280_v33  ;;  %v1284_v37 = vpack.i.bf16 %v528_v27, %v1281_v36  ;;  %v339_v26 = vmul.f32 %v1678_v7, %v1678_v7  ;;  %v420_v27 = vadd.f32 %v418_v22, %v416_v18 }
 0x151   : > { %v340_v33 = vmul.f32 %v1681_v11, %v1681_v11  ;;  %v320_v40 = vsel %vm318_vm0, %v313_v32, 0.0 }
 0x152   : > { %1283 = vxpose.xlu0.b32.start [1/2] (short) (narrow) %v1282_v34, 16  ;;  %v424_v36 = vadd.f32 %v422_v28, %v420_v27 }
 0x153   : > { %v643_v35 = vpop.permute.xlu1 %642  ;;  %v347_v44 = vsel %vm318_vm0, %v340_v33, 0.0 }
 0x154   : > { %687 = vxpose.xlu1.b32.end [2/2] (short) (narrow) %v643_v35, 16  ;;  %v345_v35 = vsel %vm318_vm0, %v339_v26, 0.0  ;;  %v426_v51 = vsub.f32 %v1693_v19, %v424_v36 }
 0x155   : > { %563 = vxpose.xlu2.b32.start [1/2] (short) (narrow) %v521_v23, 16 }
 0x15a   : > { %1285 = vxpose.xlu0.b32.end [2/2] (short) (narrow) %v1284_v37, 16  ;;  %v425_v37 = vadd.f32 %v423_v30, %v421_v29  ;;  %v447_v30 = vmul.f32 %v424_v36, %v424_v36 }
 0x15c   : > { %893 = vxpose.xlu1.b32.start [1/2] (short) (narrow) %v1681_v11, 16 }
 0x15d   : > { %564 = vxpose.xlu2.b32.end [2/2] (short) (narrow) %v523_v25, 16  ;;  %v338_v25 = vmul.f32 %v1676_v6, %v1676_v6 }
 0x15f   : > { %v344_v34 = vsel %vm318_vm0, %v338_v25, 0.0 }
 0x160   : > { %v346_v43 = vadd.f32 %v345_v35, %v344_v34  ;;  %v448_v34 = vmul.f32 %v425_v37, %v425_v37 }
 0x162   : > { %861 = vxpose.xlu0.b32.start [1/2] (short) (narrow) %v1676_v6, 16  ;;  %v348_v50 = vadd.f32 %v347_v44, %v346_v43 }
 0x164   : > { %894 = vxpose.xlu1.b32.end [2/2] (short) (narrow) %v1683_v12, 16 }
 0x16a   : > { %862 = vxpose.xlu0.b32.end [2/2] (short) (narrow) %v1678_v7, 16 }
 0x172   : > { %925 = vxpose.xlu0.b32.start [1/2] (short) (narrow) %v1693_v19, 16 }
 0x17a   : > { %926 = vxpose.xlu0.b32.end [2/2] (short) (narrow) %v1695_v20, 16 }
 0x1a0   : > { %v547_v39 = vpop.trf.xlu0 }
 0x1a8   : > { %v548_v45 = vpop.trf.xlu0 }
 0x1a9   : > { %v627_v48 = vpack.c.bf16 %v548_v45, %v547_v39  ;;  %v319_v39 = vsel %vm318_vm0, %v312_v31, 0.0 }
 0x1aa   : > { %v321_v42 = vadd.f32 %v320_v40, %v319_v39 }
 0x1ab   : > { %1174 = vmatmul.msk.bf16.vlgmr.msra.gmra.mxu1 %vm318_vm0, %v627_v48 }
 0x1ac   : > { %v323_v48 = vadd.f32 %v322_v47, %v321_v42 }
 0x1ce   : > { %374 = vadd.xlane.f32.xlu2 %v373_v53  ;;  %v324_v53 = vsel %vm318_vm0, %v315_v46, 0.0  ;;  %v450_v46 = vsel %vm318_vm0, %v448_v34, 0.0 }
 0x1de   : > { %v670_v54 = vpop.trf.xlu2 }
 0x1e6   : > { %v671_v55 = vpop.trf.xlu2 }
 0x1e7   : > { %v750_v56 = vpack.c.bf16 %v671_v55, %v670_v54  ;;  %v349_v54 = vsel %vm318_vm0, %v341_v41, 0.0  ;;  %v427_v55 = vsub.f32 %v1695_v20, %v425_v37 }
 0x1e9   : > { %1181 = vmatmul.msk.bf16.vlgmr.msra.gmra.mxu2 %vm318_vm0, %v750_v56 }
 0x1ee   : > { %v579_v57 = vpop.trf.xlu2 }
 0x1f0   : > { %v702_v58 = vpop.trf.xlu1 }
 0x1f6   : > { %v1286_v59 = vpop.trf.xlu0  ;;  %v580_v60 = vpop.trf.xlu2 }
 0x1f7   : > { %v628_v61 = vpack.c.bf16 %v580_v60, %v579_v57  ;;  %v1290_v1 = vunpack.i.h.bf16 %v1286_v59  ;;  %v1287_v3 = vunpack.i.l.bf16 %v1286_v59  ;;  %v343_v59 = vmul.f32 %v1695_v20, %v1695_v20 }
 0x1f8   : > { %v703_v62 = vpop.trf.xlu1  ;;  %v350_v60 = vadd.f32 %v349_v54, %v348_v50 }
 0x1f9   : > { %v751_v63 = vpack.c.bf16 %v703_v62, %v702_v58  ;;  %1175 = vmatmul.msk.bf16.gmra.mxu1 %vm318_vm0, %v628_v61  ;;  %v325_v58 = vadd.f32 %v324_v53, %v323_v48  ;;  %v428_v61 = vmul.f32 0.564, %v426_v51  ;;  %v317_v62 = vand.u32 2147483647, %v1695_v20 }
 0x1fb   : > { %1182 = vmatmul.msk.bf16.gmra.mxu2 %vm318_vm0, %v751_v63  ;;  %v326_v63 = vsel %vm318_vm0, %v316_v52, 0.0 }
 0x1fe   : > { %v1291_v0 = vpop.trf.xlu0 }
 0x1ff   : > { %v1295_v2 = vunpack.i.h.bf16 %v1291_v0  ;;  %v1292_v4 = vunpack.i.l.bf16 %v1291_v0  ;;  %v351_v0 = vsel %vm318_vm0, %v342_v49, 0.0 }
 0x200   : > { %v909_v49 = vpop.trf.xlu1 }
 0x201   : > { %v629_v5 = vpack.c.bf16 %v1295_v2, %v1290_v1  ;;  %v752_v8 = vpack.c.bf16 %v1292_v4, %v1287_v3  ;;  %v429_v1 = vmul.f32 0.564, %v427_v55  ;;  %v327_v3 = vadd.f32 %v326_v63, %v325_v58 }
 0x202   : > { %v352_v4 = vadd.f32 %v351_v0, %v350_v60 }
 0x206   : > { %v877_v57 = vpop.trf.xlu0 }
 0x209   : > { %1176 = vmatmul.msk.bf16.gmra.mxu1 %vm318_vm0, %v629_v5  ;;  %v353_v5 = vsel %vm318_vm0, %v343_v59, 0.0 }
 0x20a   : > { %v354_v24 = vadd.f32 %v353_v5, %v352_v4 }
 0x20b   : > { %1183 = vmatmul.msk.bf16.gmra.mxu2 %vm318_vm0, %v752_v8  ;;  %v328_v8 = vsel %vm318_vm0, %v317_v62, 0.0 }
 0x20c   : > { %v329_v22 = vadd.f32 %v328_v8, %v327_v3  ;;  %v355_v41 = vrot.slane %v354_v24, 4 }
 0x20e   : > { %v878_v21 = vpop.trf.xlu0  ;;  %v330_v40 = vrot.slane %v329_v22, 4  ;;  %v356_v54 = vadd.f32 %v355_v41, %v354_v24 }
 0x210   : > { %v331_v53 = vadd.f32 %v330_v40, %v329_v22  ;;  %v357_v8 = vrot.slane %v356_v54, 2 }
 0x228   : > { %v1727_v23 = vpop.f32.mrf.mxu1 }
 0x229   : > { %v836_v27 = vand.u32 2147483647, %v1727_v23 }
 0x22b   : > { %v842_v42 = vsel %vm318_vm0, %v836_v27, 0.0 }
 0x230   : > { %v781_v56 = vpop.f32.mrf.mxu1 }
 0x231   : > { %v837_v28 = vand.u32 2147483647, %v781_v56 }
 0x233   : > { %v843_v43 = vsel %vm318_vm0, %v837_v28, 0.0 }
 0x234   : > { %v844_v51 = vadd.f32 %v843_v43, %v842_v42 }
 0x241   : > { %v375_v9 = vpop.xlane.xlu2 %374 }
 0x242   : > { %v376_v10 = vrot.slane %v375_v9, 4 }
 0x244   : > { %v377_v13 = vadd.f32 %v376_v10, %v375_v9  ;;  %v430_v9 = vsub.f32 %v1676_v6, %v424_v36  ;;  %v460_v10 = vand.u32 2147483647, %v428_v61 }
 0x246   : > { %v378_v14 = vrot.slane %v377_v13, 2  ;;  %v462_v25 = vsel %vm318_vm0, %v460_v10, 0.0  ;;  %v432_v29 = vmul.f32 0.713, %v430_v9 }
 0x248   : > { %v379_v15 = vadd.f32 %v378_v14, %v377_v13  ;;  %v461_v13 = vand.u32 2147483647, %v429_v1  ;;  %v473_v47 = vand.u32 2147483647, %v432_v29 }
 0x24a   : > { %v380_v16 = vrot.slane %v379_v15, 1  ;;  %v463_v26 = vsel %vm318_vm0, %v461_v13, 0.0  ;;  %v475_v61 = vsel %vm318_vm0, %v473_v47, 0.0 }
 0x24b   : > { %v464_v38 = vadd.f32 %v463_v26, %v462_v25  ;;  %v358_v25 = vadd.f32 %v357_v8, %v356_v54 }
 0x24c   : > { %v381_v17 = vadd.f32 %v380_v16, %v379_v15  ;;  %v431_v15 = vsub.f32 %v1678_v7, %v425_v37  ;;  %v434_v16 = vand.u32 2147483647, %v424_v36  ;;  %v449_v36 = vsel %vm318_vm0, %v447_v30, 0.0  ;;  %v941_v30 = vpop.trf.xlu0 }
 0x24d   : > { %v465_v50 = vrot.slane %v464_v38, 4  ;;  %v451_v58 = vadd.f32 %v450_v46, %v449_v36 }
 0x24e   : > { %1197 = vpush %v381_v17  ;;  %v435_v17 = vand.u32 2147483647, %v425_v37  ;;  %v433_v31 = vmul.f32 0.713, %v431_v15  ;;  %v436_v32 = vsel %vm318_vm0, %v434_v16, 0.0 }
 0x24f   : > { %v452_v26 = vrot.slane %v451_v58, 4 }
 0x250   : > { %v437_v33 = vsel %vm318_vm0, %v435_v17, 0.0  ;;  %v474_v37 = vand.u32 2147483647, %v433_v31 }
 0x251   : > { %v438_v23 = vadd.f32 %v437_v33, %v436_v32 }
 0x252   : > { %v476_v62 = vsel %vm318_vm0, %v474_v37, 0.0  ;;  %v359_v37 = vrot.slane %v358_v25, 1 }
 0x253   : > { %v477_v13 = vadd.f32 %v476_v62, %v475_v61 }
 0x255   : > { %v478_v31 = vrot.slane %v477_v13, 4 }
 0x26c   : > { %v821_v45 = vpop.f32.mrf.mxu2 }
 0x26d   : > { %v957_v18 = vsub.f32 %v877_v57, %v821_v45  ;;  %v439_v57 = vrot.slane %v438_v23, 4 }
 0x26f   : > { %v963_v39 = vand.u32 2147483647, %v957_v18  ;;  %v440_v10 = vadd.f32 %v439_v57, %v438_v23  ;;  %v453_v23 = vadd.f32 %v452_v26, %v451_v58 }
 0x271   : > { %v1780_v52 = vsel %vm318_vm0, %v963_v39, 0.0  ;;  %v441_v40 = vrot.slane %v440_v10, 2  ;;  %v454_v58 = vrot.slane %v453_v23, 2 }
 0x274   : > { %v823_v2 = vpop.f32.mrf.mxu2 }
 0x275   : > { %v958_v35 = vsub.f32 %v878_v21, %v823_v2  ;;  %v466_v2 = vadd.f32 %v465_v50, %v464_v38 }
 0x276   : > { %v1765_v14 = vpop.f32.mrf.mxu1 }
 0x277   : > { %v964_v48 = vand.u32 2147483647, %v958_v35  ;;  %v838_v55 = vand.u32 2147483647, %v1765_v14  ;;  %v467_v21 = vrot.slane %v466_v2, 2 }
 0x279   : > { %v1788_v63 = vsel %vm318_vm0, %v964_v48, 0.0  ;;  %v468_v41 = vadd.f32 %v467_v21, %v466_v2  ;;  %v442_v2 = vadd.f32 %v441_v40, %v440_v10 }
 0x27b   : > { %v469_v57 = vrot.slane %v468_v41, 1 }
 0x27e   : > { %v1775_v44 = vpop.f32.mrf.mxu2  ;;  %v786_v45 = vpop.f32.mrf.mxu1 }
 0x27f   : > { %s1198_s20 = spop %1197  ;;  %v839_v18 = vand.u32 2147483647, %v786_v45  ;;  %v959_v27 = vsub.f32 %v909_v49, %v1775_v44  ;;  %v479_v44 = vadd.f32 %v478_v31, %v477_v13 }
 0x280   : > { %s383_s27 = smul.f32 0.0013020834, %s1198_s20 }
 0x281   : > { %v847_v38 = vsel %vm318_vm0, %v839_v18, 0.0  ;;  %v965_v45 = vand.u32 2147483647, %v959_v27 }
 0x282   : > { %v384_v56 = vstv %s383_s27 }
 0x283   : > { %v385_v59 = vsub.f32 %v1676_v6, %v384_v56  ;;  %v386_v60 = vsub.f32 %v1678_v7, %v384_v56  ;;  %v387_v0 = vsub.f32 %v1681_v11, %v384_v56  ;;  %v388_v1 = vsub.f32 %v1683_v12, %v384_v56 }
 0x284   : > { %v389_v3 = vsub.f32 %v1693_v19, %v384_v56  ;;  %v332_v7 = vrot.slane %v331_v53, 2  ;;  %v390_v14 = vsub.f32 %v1695_v20, %v384_v56  ;;  %v845_v12 = vsel %vm318_vm0, %v838_v55, 0.0  ;;  %v910_v20 = vpop.trf.xlu1 }
 0x285   : > { %v391_v4 = vand.u32 2147483647, %v385_v59  ;;  %v392_v5 = vand.u32 2147483647, %v386_v60  ;;  %v393_v6 = vand.u32 2147483647, %v387_v0  ;;  %v846_v32 = vadd.f32 %v845_v12, %v844_v51 }
 0x286   : > { %v828_v9 = vpop.f32.mrf.mxu2  ;;  %v394_v15 = vand.u32 2147483647, %v388_v1  ;;  %v789_v17 = vpop.f32.mrf.mxu1  ;;  %v395_v22 = vand.u32 2147483647, %v389_v3  ;;  %v396_v33 = vand.u32 2147483647, %v390_v14  ;;  %v333_v35 = vadd.f32 %v332_v7, %v331_v53 }
 0x287   : > { %v397_v16 = vsel %vm318_vm0, %v391_v4, 0.0  ;;  %v398_v11 = vsel %vm318_vm0, %v392_v5, 0.0  ;;  %v400_v24 = vsel %vm318_vm0, %v393_v6, 0.0  ;;  %v840_v29 = vand.u32 2147483647, %v789_v17  ;;  %v942_v7 = vpop.trf.xlu0 }
 0x288   : > { %v399_v19 = vadd.f32 %v398_v11, %v397_v16  ;;  %v402_v34 = vsel %vm318_vm0, %v394_v15, 0.0  ;;  %v404_v42 = vsel %vm318_vm0, %v395_v22, 0.0  ;;  %v960_v43 = vsub.f32 %v910_v20, %v828_v9 }
 0x289   : > { %v849_v46 = vsel %vm318_vm0, %v840_v29, 0.0  ;;  %v848_v48 = vadd.f32 %v847_v38, %v846_v32  ;;  %v406_v49 = vsel %vm318_vm0, %v396_v33, 0.0  ;;  %v480_v53 = vrot.slane %v479_v44, 2 }
 0x28a   : > { %v401_v28 = vadd.f32 %v400_v24, %v399_v19  ;;  %v334_v56 = vrot.slane %v333_v35, 1  ;;  %v966_v59 = vand.u32 2147483647, %v960_v43  ;;  %v360_v1 = vadd.f32 %v359_v37, %v358_v25 }
 0x28b   : > { %v850_v60 = vadd.f32 %v849_v46, %v848_v48  ;;  %v481_v61 = vadd.f32 %v480_v53, %v479_v44  ;;  %v972_v3 = vsel %vm318_vm0, %v965_v45, 0.0  ;;  %v971_v6 = vadd.f32 %v1788_v63, %v1780_v52 }
 0x28c   : > { %v403_v39 = vadd.f32 %v402_v34, %v401_v28  ;;  %v335_v13 = vadd.f32 %v334_v56, %v333_v35  ;;  %v470_v14 = vadd.f32 %v469_v57, %v468_v41  ;;  %v974_v15 = vsel %vm318_vm0, %v966_v59, 0.0 }
 0x28d   : > { %v482_v8 = vrot.slane %v481_v61, 1  ;;  %v455_v11 = vadd.f32 %v454_v58, %v453_v23  ;;  %v973_v12 = vadd.f32 %v972_v3, %v971_v6  ;;  %v443_v19 = vrot.slane %v442_v2, 1 }
 0x28e   : > { %v405_v36 = vadd.f32 %v404_v42, %v403_v39  ;;  %v831_v47 = vpop.f32.mrf.mxu2  ;;  %v791_v51 = vpop.f32.mrf.mxu1  ;;  %v361_v25 = vsel %vm318_vm0, %v360_v1, 0.0  ;;  %v471_v26 = vsel %vm318_vm0, %v470_v14, 0.0  ;;  %v336_v29 = vsel %vm318_vm0, %v335_v13, 0.0 }
 0x28f   : > { %v961_v50 = vsub.f32 %v941_v30, %v831_v47  ;;  %v841_v55 = vand.u32 2147483647, %v791_v51  ;;  %v483_v17 = vadd.f32 %v482_v8, %v481_v61  ;;  %v975_v63 = vadd.f32 %v974_v15, %v973_v12 }
 0x290   : > { %v407_v54 = vadd.f32 %v406_v49, %v405_v36  ;;  %v456_v30 = vrot.slane %v455_v11, 1  ;;  %v444_v33 = vadd.f32 %v443_v19, %v442_v2  ;;  %v989_v34 = vrot.slane %v361_v25, 7 }
 0x291   : > { %v851_v0 = vsel %vm318_vm0, %v841_v55, 0.0  ;;  %v967_v4 = vand.u32 2147483647, %v961_v50  ;;  %v484_v27 = vsel %vm318_vm0, %v483_v17, 0.0 }
 0x292   : > { %v408_v62 = vrot.slane %v407_v54, 4  ;;  %v852_v5 = vadd.f32 %v851_v0, %v850_v60  ;;  %v486_v39 = vadd.f32 %v484_v27, %v471_v26  ;;  %v457_v42 = vadd.f32 %v456_v30, %v455_v11 }
 0x293   : > { %v976_v21 = vsel %vm318_vm0, %v967_v4, 0.0  ;;  %v1010_v44 = vsel %vm1009_vm1, %v336_v29, %v989_v34  ;;  %v445_v46 = vsel %vm318_vm0, %v444_v33, 0.0 }
 0x294   : > { %v409_v9 = vadd.f32 %v408_v62, %v407_v54  ;;  %v853_v16 = vrot.slane %v852_v5, 4  ;;  %v977_v32 = vadd.f32 %v976_v21, %v975_v63  ;;  %v995_v47 = vrot.slane %v486_v39, 5 }
 0x295   : > { %v458_v50 = vsel %vm318_vm0, %v457_v42, 0.0  ;;  %v998_v51 = vrot.slane %v445_v46, 4 }
 0x296   : > { %v410_v18 = vrot.slane %v409_v9, 2  ;;  %v833_v10 = vpop.f32.mrf.mxu2  ;;  %v854_v22 = vadd.f32 %v853_v16, %v852_v5  ;;  %v1001_v56 = vrot.slane %v458_v50, 3 }
 0x297   : > { %v962_v24 = vsub.f32 %v942_v7, %v833_v10 }
 0x298   : > { %v411_v52 = vadd.f32 %v410_v18, %v409_v9  ;;  %v855_v28 = vrot.slane %v854_v22, 2 }
 0x299   : > { %v968_v20 = vand.u32 2147483647, %v962_v24 }
 0x29a   : > { %v412_v31 = vrot.slane %v411_v52, 1  ;;  %v856_v35 = vadd.f32 %v855_v28, %v854_v22 }
 0x29b   : > { %v978_v38 = vsel %vm318_vm0, %v968_v20, 0.0 }
 0x29c   : > { %v413_v40 = vadd.f32 %v412_v31, %v411_v52  ;;  %v979_v41 = vadd.f32 %v978_v38, %v977_v32  ;;  %v857_v36 = vrot.slane %v856_v35, 1 }
 0x29e   : > { %v414_v43 = vsel %vm318_vm0, %v413_v40, 0.0  ;;  %v980_v23 = vrot.slane %v979_v41, 4  ;;  %v858_v53 = vadd.f32 %v857_v36, %v856_v35 }
 0x29f   : > { %v992_v45 = vrot.slane %v414_v43, 6 }
 0x2a0   : > { %v981_v37 = vadd.f32 %v980_v23, %v979_v41  ;;  %v859_v60 = vsel %vm318_vm0, %v858_v53, 0.0 }
 0x2a1   : > { %v1012_v48 = vsel %vm1011_vm2, %v1010_v44, %v992_v45  ;;  %v1004_v62 = vrot.slane %v859_v60, 2 }
 0x2a2   : > { %v982_v49 = vrot.slane %v981_v37, 2  ;;  %v1014_v54 = vsel %vm1013_vm3, %v1012_v48, %v995_v47 }
 0x2a3   : > { %v1016_v59 = vsel %vm1015_vm4, %v1014_v54, %v998_v51 }
 0x2a4   : > { %v983_v55 = vadd.f32 %v982_v49, %v981_v37  ;;  %v1018_v61 = vsel %vm1017_vm5, %v1016_v59, %v1001_v56 }
 0x2a5   : > { %v1020_v2 = vsel %vm1019_vm6, %v1018_v61, %v1004_v62 }
 0x2a6   : > { %v984_v57 = vrot.slane %v983_v55, 1 }
 0x2a8   : > { %v985_v58 = vadd.f32 %v984_v57, %v983_v55 }
 0x2aa   : > { %v986_v0 = vsel %vm318_vm0, %v985_v58, 0.0 }
 0x2ab   : > { %v1007_v1 = vrot.slane %v986_v0, 1 }
 0x2ad   : > { %v1022_v3 = vsel %vm1021_vm7, %v1020_v2, %v1007_v1 }
 0x2ae   : > { %1023 = vst [vmem:[%s292_s5] sm:$0xff] %v1022_v3 }
 0x2af   : > { %1443 = shalt.err (!%p1440_p2)
}
 0x2b0   : > { %1211 = dma.vmem_to_hbm [thread:$0]  (%p1594_p3), %s1038_s6, 128, %s1040_s8, %s1025_s19  }
 0x2b1 PF: > { %s1051_s14 = sand.u32 1, %s1482_s15   ;;  %p1871_p12 = scmp.ge.s32.totalorder %s1494_s18, 2 }
 0x2b2   : > { %s1052_s25 = scalar_lea.sflag [#allocation4], %s1051_s14 }
 0x2b3   : > { %p1228_p13 = pnand %p1871_p12, %p1563_p6 }
 0x2b5   : > { %p1229_p0 = pneg %p1228_p13 }
 0x2b7   : > { %1477 = dma.done.wait (%p1229_p0), %s1052_s25, 128  }
 0x2b8   : > { %1479 = vsyncadd (%p1229_p0), %s1052_s25, 4294967168  ;;  %s1872_s21 = sld [smem:[#allocation16_spill]]  ;;  %p21_p5 = scmp.ge.s32.totalorder %s1584_s10, 4  }
 0x2b9   : > { %s1873_s15 = smov %s1486_s16  ;;  %s1874_s16 = smov %s1490_s17 }
 0x2ba   : > { %s1876_s18 = smov %s1584_s10  ;;  %23 = sbr.rel (!%p21_p5) target bundleno = 11 (0xb), region = 103 }
 0x2be   : > { %s1875_s17 = smov %s1872_s21 }
 0x2bf   :  { %1058 = vsyncpa [#allocation3], 1 }
 0x2c0   :  { %1060 = vsyncpa [#allocation3 + $0x1], 1 }
 0x2c1   :  { %1061 = vsyncpa [#allocation6], 1 }
 0x2c2   :  { %1063 = vsyncpa [#allocation6 + $0x1], 1 }
 0x2c3   :  { %1064 = vsyncpa [#allocation9], 1 }
 0x2c4   :  { %1065 = vsyncpa [#allocation4], 1 }
 0x2c5   :  { %1067 = vsyncpa [#allocation4 + $0x1], 1 }

</bundles_post_ra>
